<compile_context>
chip_gen: v7x
topology: tpu7x:2x2x1
jax: 0.10.0
libtpu: 0.0.40
codegen_flags: <defaults>
</compile_context>

<pallas_src>
import functools

import jax
import jax.numpy as jnp
from jax.experimental import pallas as pl
from jax.experimental.pallas import tpu as pltpu

NN_SIZE = 32          # hidden_size from the module
LN_EPS = 1e-5         # torch.nn.LayerNorm default eps


def qnetwork_kernel(x_ref, w1_ref, b1_ref, gamma_ref, beta_ref, w2_ref, b2_ref,
                    o_ref):
    """Fused MLP forward: (x @ W1 + b1) -> LayerNorm -> ReLU -> (W2 @ .^T + b2).

    Result is written transposed ([num_actions, tile_batch]) so the HBM store
    is lane-dense (batch on the 128-wide lane axis) instead of a 4-lane masked
    store.  Rows of x beyond the real batch (ragged last tile) only produce
    garbage in padded output columns, which the wrapper slices off.
    """
    x = x_ref[...]
    if x.dtype != jnp.float32:        # explicit dtype policy; no-op for f32 inputs
        x = x.astype(jnp.float32)

    # First linear layer (MXU), f32 accumulate.
    h = jnp.dot(x, w1_ref[...], preferred_element_type=jnp.float32) + b1_ref[...]

    # LayerNorm over the hidden axis (biased variance, like torch).
    # Single pass: E[h] and E[h^2] are independent cross-lane reductions.
    mean = jnp.mean(h, axis=-1, keepdims=True)
    mean_sq = jnp.mean(h * h, axis=-1, keepdims=True)
    var = mean_sq - mean * mean
    h = (h - mean) * jax.lax.rsqrt(var + LN_EPS)
    h = h * gamma_ref[...] + beta_ref[...]

    # ReLU.
    h = jnp.maximum(h, 0.0)

    # Second linear layer (MXU) in transposed layout: w2 is stored
    # [num_actions, hidden] (torch layout); contract the hidden dims directly
    # -> [num_actions, tile_batch], no separate transpose op needed.
    out_t = jax.lax.dot_general(
        w2_ref[...], h,
        dimension_numbers=(((1,), (1,)), ((), ())),
        preferred_element_type=jnp.float32)
    out_t = out_t + b2_ref[...]                     # b2 is [num_actions, 1]

    o_ref[...] = out_t.astype(o_ref.dtype)


def _round_up(x, m):
    return ((x + m - 1) // m) * m


def _pick_block_batch(batch):
    """Choose the batch tile.

    <=1024: one tile covering the (sublane-padded) batch -> single grid step,
            minimal per-step overhead for this tiny kernel.
    >1024:  128-aligned tiles (unmasked lane-dense stores), capped at 2048,
            with >= 2 grid steps so both v7x TensorCores are used.
    """
    if batch <= 1024:
        return max(8, _round_up(batch, 8))
    return min(2048, _round_up(pl.cdiv(batch, 2), 128))


@functools.partial(jax.jit, static_argnames=("block_batch",))
def qnetwork_forward(x, params, *, block_batch=None):
    """Runs the fused QNetwork forward pass via pallas_call.

    x: [batch, num_inputs] float32
    params: dict with w1[in,hid], b1[1,hid], gamma[1,hid], beta[1,hid],
            w2[num_actions,hid] (torch layout), b2[num_actions,1]
    Returns: [batch, num_actions] float32
    """
    batch, num_inputs = x.shape
    hidden = params["w1"].shape[1]
    num_actions = params["w2"].shape[0]

    if block_batch is None:
        block_batch = _pick_block_batch(batch)

    grid_steps = pl.cdiv(batch, block_batch)
    padded_batch = grid_steps * block_batch   # output array padded so every
                                              # output block divides evenly

    param_bytes = sum(int(p.size) * p.dtype.itemsize for p in params.values())
    cost = pl.CostEstimate(
        flops=2 * padded_batch * (num_inputs * hidden + hidden * num_actions)
        + 8 * padded_batch * hidden,
        transcendentals=padded_batch,                     # one rsqrt per row
        bytes_accessed=int(x.size) * x.dtype.itemsize
        + padded_batch * num_actions * 4
        + param_bytes,
    )

    out_t = pl.pallas_call(
        qnetwork_kernel,
        out_shape=jax.ShapeDtypeStruct((num_actions, padded_batch), jnp.float32),
        grid_spec=pltpu.PrefetchScalarGridSpec(
            num_scalar_prefetch=0,
            grid=(grid_steps,),
            in_specs=[
                # x: tiled along batch; last tile may be a ragged read.
                pl.BlockSpec((block_batch, num_inputs), lambda i: (i, 0)),
                # parameters: full, constant block index (no re-DMA per step).
                pl.BlockSpec((num_inputs, hidden), lambda i: (0, 0)),
                pl.BlockSpec((1, hidden), lambda i: (0, 0)),
                pl.BlockSpec((1, hidden), lambda i: (0, 0)),
                pl.BlockSpec((1, hidden), lambda i: (0, 0)),
                pl.BlockSpec((num_actions, hidden), lambda i: (0, 0)),
                pl.BlockSpec((num_actions, 1), lambda i: (0, 0)),
            ],
            # Lane-dense output: batch on the lane axis.
            out_specs=pl.BlockSpec((num_actions, block_batch), lambda i: (0, i)),
        ),
        compiler_params=pltpu.CompilerParams(
            dimension_semantics=("parallel",)),
        cost_estimate=cost,
    )(x, params["w1"], params["b1"], params["gamma"], params["beta"],
      params["w2"], params["b2"])

    # Drop the padded columns, back to PyTorch [batch, num_actions] layout.
    return out_t[:, :batch].T


def init_params(key, num_inputs, num_actions, hidden_size=NN_SIZE):
    """Deterministic synthetic init mimicking the torch module's parameters.

    w1 is stored transposed vs torch ([in, hid]) so the kernel does x @ W1;
    w2 keeps the torch layout ([num_actions, hid]) because the kernel computes
    the second matmul in transposed (lane-dense) form.
    """
    k1, k2, k3, k4 = jax.random.split(key, 4)
    bound1 = 1.0 / jnp.sqrt(num_inputs)
    bound2 = 1.0 / jnp.sqrt(hidden_size)
    params = {
        "w1": jax.random.uniform(k1, (num_inputs, hidden_size),
                                 jnp.float32, -bound1, bound1),
        "b1": jax.random.uniform(k2, (1, hidden_size),
                                 jnp.float32, -bound1, bound1),
        # LayerNorm: elementwise_affine=True default -> gamma=1, beta=0
        "gamma": jnp.ones((1, hidden_size), jnp.float32),
        "beta": jnp.zeros((1, hidden_size), jnp.float32),
        "w2": jax.random.uniform(k3, (num_actions, hidden_size),
                                 jnp.float32, -bound2, bound2),
        "b2": jax.random.uniform(k4, (num_actions, 1),
                                 jnp.float32, -bound2, bound2),
    }
    return params


def reference_forward(x, params):
    """Pure-JAX reference matching the torch semantics."""
    h = x @ params["w1"] + params["b1"]
    mean = jnp.mean(h, axis=-1, keepdims=True)
    var = jnp.mean((h - mean) ** 2, axis=-1, keepdims=True)
    h = (h - mean) / jnp.sqrt(var + LN_EPS) * params["gamma"] + params["beta"]
    h = jnp.maximum(h, 0.0)
    return h @ params["w2"].T + params["b2"].T


if __name__ == "__main__":
    key = jax.random.PRNGKey(0)
    k_in, k_in2, k_par = jax.random.split(key, 3)

    batch = 8
    num_inputs = 16
    num_actions = 4

    params = init_params(k_par, num_inputs, num_actions, hidden_size=NN_SIZE)

    # Small-shape check (single tile, single grid step).
    x = jax.random.normal(k_in, (batch, num_inputs), jnp.float32)
    out = jax.block_until_ready(qnetwork_forward(x, params))
    ref = reference_forward(x, params)
    assert out.shape == (batch, num_actions), out.shape
    assert jnp.allclose(out, ref, atol=1e-4, rtol=1e-4), (
        float(jnp.max(jnp.abs(out - ref))))

    # Larger batch exercises the multi-step (megacore-parallel) lane-dense path
    # with a ragged last input tile and padded output columns.
    batch2 = 1500
    x2 = jax.random.normal(k_in2, (batch2, num_inputs), jnp.float32)
    out2 = jax.block_until_ready(qnetwork_forward(x2, params))
    ref2 = reference_forward(x2, params)
    assert out2.shape == (batch2, num_actions), out2.shape
    assert jnp.allclose(out2, ref2, atol=1e-4, rtol=1e-4), (
        float(jnp.max(jnp.abs(out2 - ref2))))

    print("KERNEL_OK")
</pallas_src>

<mosaic_0001>
module attributes {stable_mosaic.version = 11 : i64} {
  func.func @qnetwork_kernel(%arg0: i32, %arg1: memref<8x16xf32, #tpu.memory_space<vmem>>, %arg2: memref<16x32xf32, #tpu.memory_space<vmem>>, %arg3: memref<1x32xf32, #tpu.memory_space<vmem>>, %arg4: memref<1x32xf32, #tpu.memory_space<vmem>>, %arg5: memref<1x32xf32, #tpu.memory_space<vmem>>, %arg6: memref<4x32xf32, #tpu.memory_space<vmem>>, %arg7: memref<4x1xf32, #tpu.memory_space<vmem>>, %arg8: memref<4x8xf32, #tpu.memory_space<vmem>>) attributes {dimension_semantics = [#tpu.dimension_semantics<parallel>], iteration_bounds = array<i64: 1>, scalar_prefetch = 0 : i64, scratch_operands = 0 : i64, tpu.core_type = #tpu.core_type<tc>, window_params = [{transform_indices = @transform_0, window_bounds = array<i64: 8, 16>}, {pipeline_mode = #tpu.pipeline_mode<synchronous>, transform_indices = @transform_1, window_bounds = array<i64: 16, 32>}, {pipeline_mode = #tpu.pipeline_mode<synchronous>, transform_indices = @transform_2, window_bounds = array<i64: 1, 32>}, {pipeline_mode = #tpu.pipeline_mode<synchronous>, transform_indices = @transform_3, window_bounds = array<i64: 1, 32>}, {pipeline_mode = #tpu.pipeline_mode<synchronous>, transform_indices = @transform_4, window_bounds = array<i64: 1, 32>}, {pipeline_mode = #tpu.pipeline_mode<synchronous>, transform_indices = @transform_5, window_bounds = array<i64: 4, 32>}, {pipeline_mode = #tpu.pipeline_mode<synchronous>, transform_indices = @transform_6, window_bounds = array<i64: 4, 1>}, {transform_indices = @transform_7, window_bounds = array<i64: 4, 8>}]} {
    %c0 = arith.constant 0 : index
    %c0_0 = arith.constant 0 : index
    %0 = vector.load %arg1[%c0, %c0_0] : memref<8x16xf32, #tpu.memory_space<vmem>>, vector<8x16xf32>
    %c0_1 = arith.constant 0 : index
    %c0_2 = arith.constant 0 : index
    %1 = vector.load %arg2[%c0_1, %c0_2] : memref<16x32xf32, #tpu.memory_space<vmem>>, vector<16x32xf32>
    %cst = arith.constant dense<0.000000e+00> : vector<8x32xf32>
    %2 = tpu.matmul %0, %1, %cst {dimension_numbers = #tpu.dot_dimension_numbers<[1], [0], [0], [1], [0, 0, 1, 1], [], []>} : vector<8x16xf32>, vector<16x32xf32>, vector<8x32xf32> -> vector<8x32xf32>
    %c0_3 = arith.constant 0 : index
    %c0_4 = arith.constant 0 : index
    %3 = vector.load %arg3[%c0_3, %c0_4] : memref<1x32xf32, #tpu.memory_space<vmem>>, vector<1x32xf32>
    %4 = vector.broadcast %3 : vector<1x32xf32> to vector<8x32xf32>
    %5 = arith.addf %2, %4 : vector<8x32xf32>
    %cst_5 = arith.constant dense<0.000000e+00> : vector<8xf32>
    %6 = vector.multi_reduction <add>, %5, %cst_5 [1] : vector<8x32xf32> to vector<8xf32>
    %7 = vector.shape_cast %6 : vector<8xf32> to vector<8x1xf32>
    %cst_6 = arith.constant 3.200000e+01 : f32
    %8 = vector.broadcast %cst_6 : f32 to vector<8x1xf32>
    %9 = arith.divf %7, %8 : vector<8x1xf32>
    %10 = arith.mulf %5, %5 : vector<8x32xf32>
    %cst_7 = arith.constant dense<0.000000e+00> : vector<8xf32>
    %11 = vector.multi_reduction <add>, %10, %cst_7 [1] : vector<8x32xf32> to vector<8xf32>
    %12 = vector.shape_cast %11 : vector<8xf32> to vector<8x1xf32>
    %cst_8 = arith.constant 3.200000e+01 : f32
    %13 = vector.broadcast %cst_8 : f32 to vector<8x1xf32>
    %14 = arith.divf %12, %13 : vector<8x1xf32>
    %15 = arith.mulf %9, %9 : vector<8x1xf32>
    %16 = arith.subf %14, %15 : vector<8x1xf32>
    %17 = vector.broadcast %9 : vector<8x1xf32> to vector<8x32xf32>
    %18 = arith.subf %5, %17 : vector<8x32xf32>
    %cst_9 = arith.constant 9.99999974E-6 : f32
    %19 = vector.broadcast %cst_9 : f32 to vector<8x1xf32>
    %20 = arith.addf %16, %19 : vector<8x1xf32>
    %21 = math.rsqrt %20 : vector<8x1xf32>
    %22 = vector.broadcast %21 : vector<8x1xf32> to vector<8x32xf32>
    %23 = arith.mulf %18, %22 : vector<8x32xf32>
    %c0_10 = arith.constant 0 : index
    %c0_11 = arith.constant 0 : index
    %24 = vector.load %arg4[%c0_10, %c0_11] : memref<1x32xf32, #tpu.memory_space<vmem>>, vector<1x32xf32>
    %25 = vector.broadcast %24 : vector<1x32xf32> to vector<8x32xf32>
    %26 = arith.mulf %23, %25 : vector<8x32xf32>
    %c0_12 = arith.constant 0 : index
    %c0_13 = arith.constant 0 : index
    %27 = vector.load %arg5[%c0_12, %c0_13] : memref<1x32xf32, #tpu.memory_space<vmem>>, vector<1x32xf32>
    %28 = vector.broadcast %27 : vector<1x32xf32> to vector<8x32xf32>
    %29 = arith.addf %26, %28 : vector<8x32xf32>
    %cst_14 = arith.constant 0.000000e+00 : f32
    %30 = vector.broadcast %cst_14 : f32 to vector<8x32xf32>
    %31 = arith.maximumf %29, %30 : vector<8x32xf32>
    %c0_15 = arith.constant 0 : index
    %c0_16 = arith.constant 0 : index
    %32 = vector.load %arg6[%c0_15, %c0_16] : memref<4x32xf32, #tpu.memory_space<vmem>>, vector<4x32xf32>
    %cst_17 = arith.constant dense<0.000000e+00> : vector<4x8xf32>
    %33 = tpu.matmul %32, %31, %cst_17 {dimension_numbers = #tpu.dot_dimension_numbers<[1], [1], [0], [0], [0, 0, 1, 0], [], []>} : vector<4x32xf32>, vector<8x32xf32>, vector<4x8xf32> -> vector<4x8xf32>
    %c0_18 = arith.constant 0 : index
    %c0_19 = arith.constant 0 : index
    %34 = vector.load %arg7[%c0_18, %c0_19] : memref<4x1xf32, #tpu.memory_space<vmem>>, vector<4x1xf32>
    %35 = vector.broadcast %34 : vector<4x1xf32> to vector<4x8xf32>
    %36 = arith.addf %33, %35 : vector<4x8xf32>
    %c0_20 = arith.constant 0 : index
    %c0_21 = arith.constant 0 : index
    %37 = vector.load %arg8[%c0_20, %c0_21] : memref<4x8xf32, #tpu.memory_space<vmem>>, vector<4x8xf32>
    tpu.vector_store %arg8[%c0_20, %c0_21], %36 {strides = array<i32>} : memref<4x8xf32, #tpu.memory_space<vmem>>, vector<4x8xf32>,
    return
  }
  func.func @transform_0(%arg0: i32) -> (i32, i32) {
    %c0_i32 = arith.constant 0 : i32
    %c0_i32_0 = arith.constant 0 : i32
    return %arg0, %c0_i32 : i32, i32
  }
  func.func @transform_1(%arg0: i32) -> (i32, i32) {
    %c0_i32 = arith.constant 0 : i32
    %c0_i32_0 = arith.constant 0 : i32
    %c0_i32_1 = arith.constant 0 : i32
    return %c0_i32, %c0_i32_0 : i32, i32
  }
  func.func @transform_2(%arg0: i32) -> (i32, i32) {
    %c0_i32 = arith.constant 0 : i32
    %c0_i32_0 = arith.constant 0 : i32
    %c0_i32_1 = arith.constant 0 : i32
    return %c0_i32, %c0_i32_0 : i32, i32
  }
  func.func @transform_3(%arg0: i32) -> (i32, i32) {
    %c0_i32 = arith.constant 0 : i32
    %c0_i32_0 = arith.constant 0 : i32
    %c0_i32_1 = arith.constant 0 : i32
    return %c0_i32, %c0_i32_0 : i32, i32
  }
  func.func @transform_4(%arg0: i32) -> (i32, i32) {
    %c0_i32 = arith.constant 0 : i32
    %c0_i32_0 = arith.constant 0 : i32
    %c0_i32_1 = arith.constant 0 : i32
    return %c0_i32, %c0_i32_0 : i32, i32
  }
  func.func @transform_5(%arg0: i32) -> (i32, i32) {
    %c0_i32 = arith.constant 0 : i32
    %c0_i32_0 = arith.constant 0 : i32
    %c0_i32_1 = arith.constant 0 : i32
    return %c0_i32, %c0_i32_0 : i32, i32
  }
  func.func @transform_6(%arg0: i32) -> (i32, i32) {
    %c0_i32 = arith.constant 0 : i32
    %c0_i32_0 = arith.constant 0 : i32
    %c0_i32_1 = arith.constant 0 : i32
    return %c0_i32, %c0_i32_0 : i32, i32
  }
  func.func @transform_7(%arg0: i32) -> (i32, i32) {
    %c0_i32 = arith.constant 0 : i32
    %c0_i32_0 = arith.constant 0 : i32
    return %c0_i32, %arg0 : i32, i32
  }
}

</mosaic_0001>

<bundles_post_ra>
// kernel: qnetwork_forward.1
= control target key start
LH: loop header
LB: loop body
LE: loop exit
PB: predicated region body
PF: predicated region fallthrough
CT: control target
= control target key end

     0   :  { %12 = vsyncpa [#allocation3], 0  ;;  %s484_s0 = inlined_call_operand.hbm [shape: f32[8,16], index: 0, kind: input, shape index: {}]   ;;  %s485_s1 = inlined_call_operand.vmem [shape: f32[16,32], index: 1, kind: input, shape index: {}]   ;;  %s486_s2 = inlined_call_operand.vmem [shape: f32[1,32], index: 2, kind: input, shape index: {}]   ;;  %s487_s3 = inlined_call_operand.vmem [shape: f32[1,32], index: 3, kind: input, shape index: {}]   ;;  %s488_s4 = inlined_call_operand.hbm [shape: f32[1,32], index: 4, kind: input, shape index: {}]   ;;  %s489_s5 = inlined_call_operand.vmem [shape: f32[4,32], index: 5, kind: input, shape index: {}]   ;;  %s490_s6 = inlined_call_operand.vmem [shape: f32[4,1], index: 6, kind: input, shape index: {}]   ;;  %s491_s7 = inlined_call_operand.hbm [shape: f32[4,8], index: 7, kind: output, shape index: {}]  }
   0x1   :  { %13 = vsyncpa [#allocation6], 0 }
   0x2   :  { %14 = vsyncpa [#allocation4], 0  ;;  %s379_s24 = smov [#allocation2]   ;;  %s380_s26 = smov [#allocation5]  }
   0x3   :  { %s21_s25 = sshll.u32 %s379_s24, 4  ;;  %s37_s27 = sshll.u32 %s380_s26, 4  ;;  %s22_s25 = int_to_ptr.vmem [resolvable:$true] %s21_s25  ;;  %s38_s27 = int_to_ptr.vmem [resolvable:$true] %s37_s27 }
   0x4   :  { %s307_s30 = scalar_lea.hbm %s484_s0, 128 }
   0x5   :  { %p308_p0 = scmp.ne.s32.totalorder %s484_s0, %s307_s30  ;;  %p311_p1 = scmp.lt.u32.totalorder %s307_s30, %s484_s0 }
   0x7   :  { %p313_p2 = pnand %p311_p1, %p308_p0 }
   0x9   :  { %316 = shalt.err (!%p313_p2)
}
   0xa   :  { %s317_s12 = scalar_lea.vmem %s22_s25, 128  ;;  %p322_p4 = scmp.lt.s32.totalorder %s22_s25, %s22_s25 }
   0xb   :  { %p318_p3 = scmp.ne.s32.totalorder %s22_s25, %s317_s12  ;;  %p323_p5 = scmp.lt.s32.totalorder %s317_s12, %s317_s12 }
   0xd   :  { %p324_p6 = por %p323_p5, %p322_p4 }
   0xf   :  { %p325_p7 = pnand %p324_p6, %p318_p3 }
  0x11   :  { %328 = shalt.err (!%p325_p7)
}
  0x12   :  { %24 = dma.hbm_to_vmem [thread:$0]  %s484_s0, 128, %s22_s25, [#allocation3]  }
  0x13   :  { %s329_s17 = scalar_lea.hbm %s488_s4, 16 }
  0x14   :  { %p330_p8 = scmp.ne.s32.totalorder %s488_s4, %s329_s17  ;;  %p333_p9 = scmp.lt.u32.totalorder %s329_s17, %s488_s4 }
  0x16   :  { %p335_p10 = pnand %p333_p9, %p330_p8 }
  0x18   :  { %338 = shalt.err (!%p335_p10)
}
  0x19   :  { %s339_s22 = scalar_lea.vmem %s38_s27, 16  ;;  %s343_s23 = scalar_lea.vmem %s38_s27, 32 }
  0x1a   :  { %p340_p11 = scmp.ne.s32.totalorder %s38_s27, %s339_s22  ;;  %p344_p12 = scmp.lt.s32.totalorder %s38_s27, %s38_s27 }
  0x1b   :  { %p345_p13 = scmp.lt.s32.totalorder %s343_s23, %s339_s22 }
  0x1d   :  { %p346_p0 = por %p345_p13, %p344_p12 }
  0x1f   :  { %p347_p1 = pnand %p346_p0, %p340_p11 }
  0x21   :  { %350 = shalt.err (!%p347_p1)
}
  0x22   :  { %40 = dma.hbm_to_vmem [thread:$0]  %s488_s4, 16, %s38_s27, [#allocation6]  }
  0x23   :  { %373 = dma.done.wait [#allocation3], 128  }
  0x24   :  { %374 = vsyncadd [#allocation3], 4294967168 }
  0x25   :  { %375 = dma.done.wait [#allocation6], 16  }
  0x26   :  { %376 = vsyncadd [#allocation6], 4294967280  ;;  %v381_v0 = vmov 0.0|0.0   ;;  %vm382_vm0 = vmmov 0   ;;  %v383_v1 = vmov 0.0   ;;  %v52_v2 = vld [vmem:[%s485_s1] sm:$0xff] }
  0x27   :  { %293 = vmatprep.subr.bf16.mxu0 %v381_v0  ;;  %285 = vmatprep.mubr.msk.f32.mxu0 %vm382_vm0, %v383_v1  ;;  %v53_v3 = vld [vmem:[%s485_s1 + $0x8] sm:$0xff]  ;;  %v51_v5 = vld [vmem:[#allocation2] sm:$0xff]  ;;  %vm61_vm1 = vcmask 130048   ;;  %vm135_vm2 = vcmask 261120   ;;  %v384_v14 = vmov 0   ;;  %s385_s10 = smov [#allocation7]  }
  0x28   :  { %288 = vmatprep.subr.mxu1 %v383_v1  ;;  %290 = vmatprep.mubr.msk.f32.mxu1 %vm382_vm0, %v383_v1  ;;  %v294_v4 = vpack.c.bf16 %v53_v3, %v52_v2  ;;  %v270_v6 = vld [vmem:[%s486_s2] ss:$0 sm:$0xff]  ;;  %v273_v26 = vld [vmem:[#allocation5] ss:$0 sm:$0xff]  ;;  %s260_s11 = sshll.u32 %s385_s10, 4  ;;  %vm252_vm3 = vcmask 60416   ;;  %s261_s11 = int_to_ptr.vmem [resolvable:$true] %s260_s11 }
  0x29   :  { %v170_v13 = vld [vmem:[%s490_s6] sm:$0xf]  ;;  %303 = vset.pattern.permute.xlu1 %v384_v14  ;;  %304 = vset.pattern.permute.xlu0 %v384_v14  ;;  %p356_p3 = scmp.lt.s32.totalorder %s261_s11, %s261_s11 }
  0x2a   :  { %295 = vmatpush3.bf16.msra.mxu0 %v294_v4  ;;  %173 = vperm.xlu1 %303, %v170_v13   ;;  %v272_v24 = vld [vmem:[%s487_s3] ss:$0 sm:$0xff]  ;;  %s351_s3 = scalar_lea.vmem %s261_s11, 64 }
  0x2b   :  { %v169_v30 = vld [vmem:[%s489_s5] sm:$0xf]  ;;  %p352_p2 = scmp.ne.s32.totalorder %s261_s11, %s351_s3  ;;  %p357_p4 = scmp.lt.s32.totalorder %s351_s3, %s351_s3 }
  0x2d   :  { %286 = vmatmul.mubr.msk.f32.vlgmr.msra.gmra.mrb[0].mxu0 %vm61_vm1, %v51_v5  ;;  %p358_p5 = por %p357_p4, %p356_p3 }
  0x2f   :  { %p359_p6 = pnand %p358_p5, %p352_p2 }
  0xa9   :  { %v174_v31 = vpop.permute.xlu1 %173 }
 0x100   :  { %v131_v7 = vpop.f32.mrb[0].mxu0 }
 0x101   :  { %v132_v8 = vadd.f32 %v270_v6, %v131_v7  ;;  %v287_v9 = vpop.f32.mrb[1].mxu0 }
 0x103   :  { %v136_v10 = vsel %vm135_vm2, %v132_v8, 0.0  ;;  %v141_v11 = vmul.f32 %v132_v8, %v132_v8 }
 0x104   :  { %137 = vadd.xlane.f32.xlu0 %v136_v10 }
 0x105   :  { %v142_v12 = vsel %vm135_vm2, %v141_v11, 0.0 }
 0x108   :  { %143 = vadd.xlane.f32.xlu0 %v142_v12 }
 0x191   :  { %v138_v15 = vpop.xlane.xlu0 %137 }
 0x192   :  { %v140_v16 = vmul.f32 0.03125, %v138_v15 }
 0x194   :  { %v146_v18 = vmul.f32 %v140_v16, %v140_v16  ;;  %v148_v22 = vsub.f32 %v132_v8, %v140_v16 }
 0x195   :  { %v144_v17 = vpop.xlane.xlu0 %143 }
 0x196   :  { %v145_v19 = vmul.f32 0.03125, %v144_v17 }
 0x198   :  { %v147_v20 = vsub.f32 %v145_v19, %v146_v18 }
 0x19a   :  { %v149_v21 = vadd.f32 1e-05, %v147_v20 }
 0x19c   :  { %305 = vrsqrt.f32 %v149_v21 }
 0x1a6   :  { %v306_v23 = vpop.eup %305 }
 0x1a7   :  { %v151_v25 = vmul.f32 %v306_v23, %v148_v22 }
 0x1a9   :  { %v159_v27 = vmul.f32 %v272_v24, %v151_v25 }
 0x1ab   :  { %v167_v28 = vadd.f32 %v273_v26, %v159_v27 }
 0x1ad   :  { %v168_v29 = vmax.f32 %v167_v28, 0.0 }
 0x1af   :  { %289 = vmatpush3.xpose.msk.msra.mxu1 %vm135_vm2, %v168_v29 }
 0x1b2   :  { %291 = vmatmul.mubr.msk.f32.vlgmr.msra.gmra.mrb[0].mxu1 %vm135_vm2, %v169_v30 }
 0x285   :  { %v248_v32 = vpop.f32.mrb[0].mxu1 }
 0x286   :  { %v249_v33 = vadd.f32 %v248_v32, %v174_v31  ;;  %v292_v34 = vpop.f32.mrb[1].mxu1 }
 0x288   :  { %253 = vst.msk [vmem:[#allocation7] sm:$0xf] %vm252_vm3, %v249_v33 }
 0x289   :  { %362 = shalt.err (!%p359_p6)
}
 0x28a   :  { %s363_s13 = scalar_lea.hbm %s491_s7, 64 }
 0x28b   :  { %p364_p7 = scmp.ne.s32.totalorder %s491_s7, %s363_s13  ;;  %p367_p8 = scmp.lt.u32.totalorder %s363_s13, %s491_s7 }
 0x28d   :  { %p369_p9 = pnand %p367_p8, %p364_p7 }
 0x28f   :  { %372 = shalt.err (!%p369_p9)
}
 0x290   :  { %263 = dma.vmem_to_hbm [thread:$0]  %s261_s11, 64, %s491_s7, [#allocation4]  }
 0x291   :  { %377 = dma.done.wait [#allocation4], 64  }
 0x292   :  { %378 = vsyncadd [#allocation4], 4294967232 }
 0x293   :  { %267 = vsyncpa [#allocation3], 1 }
 0x294   :  { %268 = vsyncpa [#allocation6], 1 }
 0x295   :  { %269 = vsyncpa [#allocation4], 1 }

</bundles_post_ra>
